<compile_context>
chip_gen: v5e
topology: v5e:2x2
jax: 0.10.0
libtpu: 0.0.40
codegen_flags: <defaults>
</compile_context>

<pallas_src>
import functools

import jax
import jax.numpy as jnp
from jax import lax
from jax.experimental import pallas as pl
from jax.experimental.pallas import tpu as pltpu


def skipgram_kernel(f_ids_ref, c_ids_ref,   # SMEM scalar-prefetch ids, int32 [B_pad]
                    emb_hbm,                # embedding table, stays in HBM (ANY), [V, E]
                    out_ref,                # VMEM output tile, (1, tile_b) float32
                    ef_buf, ec_buf,         # VMEM scratch, (tile_b, E)
                    sems,                   # DMA semaphores, (2,)
                    *, tile_b):
    base = pl.program_id(0) * tile_b

    # ---- Gather phase: one row DMA per (focus, context) id, HBM -> VMEM scratch.
    def issue(r, carry):
        f = f_ids_ref[base + r]
        c = c_ids_ref[base + r]
        pltpu.make_async_copy(emb_hbm.at[pl.ds(f, 1), :],
                              ef_buf.at[pl.ds(r, 1), :], sems.at[0]).start()
        pltpu.make_async_copy(emb_hbm.at[pl.ds(c, 1), :],
                              ec_buf.at[pl.ds(r, 1), :], sems.at[1]).start()
        return carry

    lax.fori_loop(0, tile_b, issue, 0)

    # ---- Drain: every copy has identical size, so per-row waits fully drain the sems.
    # TODO(synk): overlap tile i+1 row-gather DMAs with tile i compute (manual double-buffer).
    def drain(r, carry):
        pltpu.make_async_copy(emb_hbm.at[pl.ds(0, 1), :],
                              ef_buf.at[pl.ds(r, 1), :], sems.at[0]).wait()
        pltpu.make_async_copy(emb_hbm.at[pl.ds(0, 1), :],
                              ec_buf.at[pl.ds(r, 1), :], sems.at[1]).wait()
        return carry

    lax.fori_loop(0, tile_b, drain, 0)

    # ---- Compute: per-row dot product (== bmm((B,1,E),(B,E,1))) + stable logsigmoid.
    ef = ef_buf[...].astype(jnp.float32)
    ec = ec_buf[...].astype(jnp.float32)
    s = jnp.sum(ef * ec, axis=-1)                                    # (tile_b,)
    lp = jnp.minimum(s, 0.0) - jnp.log1p(jnp.exp(-jnp.abs(s)))       # logsigmoid(s)
    out_ref[...] = lp.reshape(1, tile_b)                             # lane-dense store


def skipgram_forward(focus, context, emb_table, *, tile_b=128):
    """focus, context: int [B]; emb_table: [V, E] float. Returns float32 [B, 1, 1]."""
    assert tile_b % 128 == 0, "tile_b must be a multiple of 128 (lane-dense output)"
    B = focus.shape[0]
    V, E = emb_table.shape

    num_tiles = pl.cdiv(B, tile_b)
    B_pad = num_tiles * tile_b

    # Pad ids with 0 (a valid row) up to a full tile; padded outputs are discarded.
    focus_p = jnp.zeros((B_pad,), jnp.int32).at[:B].set(focus.astype(jnp.int32))
    context_p = jnp.zeros((B_pad,), jnp.int32).at[:B].set(context.astype(jnp.int32))

    bytes_accessed = 2 * B_pad * E * emb_table.dtype.itemsize + 2 * B_pad * 4 + B_pad * 4

    out = pl.pallas_call(
        functools.partial(skipgram_kernel, tile_b=tile_b),
        out_shape=jax.ShapeDtypeStruct((1, B_pad), jnp.float32),
        grid_spec=pltpu.PrefetchScalarGridSpec(
            num_scalar_prefetch=2,                       # focus ids, context ids -> SMEM
            grid=(num_tiles,),
            in_specs=[
                pl.BlockSpec(memory_space=pl.ANY),       # embedding table stays in HBM
            ],
            out_specs=pl.BlockSpec((1, tile_b), lambda i, f_ids, c_ids: (0, i)),
            scratch_shapes=[
                pltpu.VMEM((tile_b, E), emb_table.dtype),   # gathered focus rows
                pltpu.VMEM((tile_b, E), emb_table.dtype),   # gathered context rows
                pltpu.SemaphoreType.DMA((2,)),
            ],
        ),
        compiler_params=pltpu.CompilerParams(
            dimension_semantics=("parallel",),           # batch tiles are independent
            vmem_limit_bytes=16 * 1024 * 1024,           # scratch footprint is tiny; fits v5e default
        ),
        cost_estimate=pl.CostEstimate(
            flops=2 * B_pad * E,                         # per-row dot products
            transcendentals=2 * B_pad,                   # exp + log per score
            bytes_accessed=bytes_accessed,
        ),
    )(focus_p, context_p, emb_table)

    return out.reshape(-1)[:B].reshape(B, 1, 1)


if __name__ == "__main__":
    vocab_size = 32
    embed_size = 64
    batch = 8

    key = jax.random.PRNGKey(0)
    k_emb, k_focus, k_ctx = jax.random.split(key, 3)

    # nn.Embedding default init: N(0, 1); padding_idx=0 -> row 0 is zero.
    emb_table = jax.random.normal(k_emb, (vocab_size, embed_size), dtype=jnp.float32)
    emb_table = emb_table.at[0].set(0.0)

    focus = jax.random.randint(k_focus, (batch,), 0, vocab_size, dtype=jnp.int32)
    context = jax.random.randint(k_ctx, (batch,), 0, vocab_size, dtype=jnp.int32)

    log_probs = skipgram_forward(focus, context, emb_table)
    log_probs = jax.block_until_ready(log_probs)

    # Pure-JAX reference for a sanity check of the kernel semantics.
    ef = emb_table[focus]                     # (B, E)
    ec = emb_table[context]                   # (B, E)
    ref = jax.nn.log_sigmoid(jnp.sum(ef * ec, axis=-1)).reshape(batch, 1, 1)
    assert log_probs.shape == (batch, 1, 1)
    assert jnp.allclose(log_probs, ref, atol=1e-5, rtol=1e-5)

    print("KERNEL_OK")
</pallas_src>

<mosaic_0001>
module attributes {stable_mosaic.version = 11 : i64} {
  func.func @skipgram_kernel(%arg0: i32, %arg1: memref<128xi32, #tpu.memory_space<smem>>, %arg2: memref<128xi32, #tpu.memory_space<smem>>, %arg3: memref<32x64xf32, #tpu.memory_space<any>>, %arg4: memref<1x128xf32, #tpu.memory_space<vmem>>, %arg5: memref<128x64xf32, #tpu.memory_space<vmem>>, %arg6: memref<128x64xf32, #tpu.memory_space<vmem>>, %arg7: memref<2x!tpu.dma_semaphore, #tpu.memory_space<semaphore_mem>>) attributes {dimension_semantics = [#tpu.dimension_semantics<parallel>], iteration_bounds = array<i64: 1>, scalar_prefetch = 2 : i64, scratch_operands = 3 : i64, tpu.core_type = #tpu.core_type<tc>, window_params = [{}, {transform_indices = @transform_1, window_bounds = array<i64: 1, 128>}]} {
    %c128_i32 = arith.constant 128 : i32
    %0 = arith.muli %arg0, %c128_i32 : i32
    %c0_i32 = arith.constant 0 : i32
    %c128_i32_0 = arith.constant 128 : i32
    %1 = arith.addi %c0_i32, %c128_i32_0 : i32
    %c1_i32 = arith.constant 1 : i32
    scf.for %arg8 = %c0_i32 to %1 step %c1_i32  : i32 {
      %17 = arith.addi %0, %arg8 : i32
      %18 = arith.index_cast %17 : i32 to index
      %19 = memref.load %arg1[%18] : memref<128xi32, #tpu.memory_space<smem>>
      %20 = arith.addi %0, %arg8 : i32
      %21 = arith.index_cast %20 : i32 to index
      %22 = memref.load %arg2[%21] : memref<128xi32, #tpu.memory_space<smem>>
      %c0_i32_13 = arith.constant 0 : i32
      %c0_i32_14 = arith.constant 0 : i32
      %23 = tpu.memref_slice %arg3[%19, %c0_i32_14] : memref<32x64xf32, #tpu.memory_space<any>> -> memref<1x64xf32, #tpu.memory_space<any>>
      %c0_i32_15 = arith.constant 0 : i32
      %24 = tpu.memref_slice %arg5[%arg8, %c0_i32_15] : memref<128x64xf32, #tpu.memory_space<vmem>> -> memref<1x64xf32, #tpu.memory_space<vmem>>
      %25 = tpu.memref_slice %arg7[%c0_i32_13] : memref<2x!tpu.dma_semaphore, #tpu.memory_space<semaphore_mem>> -> memref<1x!tpu.dma_semaphore, #tpu.memory_space<semaphore_mem>>
      %26 = tpu.memref_squeeze %25 : memref<1x!tpu.dma_semaphore, #tpu.memory_space<semaphore_mem>> -> memref<!tpu.dma_semaphore, #tpu.memory_space<semaphore_mem>>
      tpu.enqueue_dma source(%23 : memref<1x64xf32, #tpu.memory_space<any>>) target(%24 : memref<1x64xf32, #tpu.memory_space<vmem>>) target_semaphore(%26 : memref<!tpu.dma_semaphore, #tpu.memory_space<semaphore_mem>>)
      %c1_i32_16 = arith.constant 1 : i32
      %c0_i32_17 = arith.constant 0 : i32
      %27 = tpu.memref_slice %arg3[%22, %c0_i32_17] : memref<32x64xf32, #tpu.memory_space<any>> -> memref<1x64xf32, #tpu.memory_space<any>>
      %c0_i32_18 = arith.constant 0 : i32
      %28 = tpu.memref_slice %arg6[%arg8, %c0_i32_18] : memref<128x64xf32, #tpu.memory_space<vmem>> -> memref<1x64xf32, #tpu.memory_space<vmem>>
      %29 = tpu.memref_slice %arg7[%c1_i32_16] : memref<2x!tpu.dma_semaphore, #tpu.memory_space<semaphore_mem>> -> memref<1x!tpu.dma_semaphore, #tpu.memory_space<semaphore_mem>>
      %30 = tpu.memref_squeeze %29 : memref<1x!tpu.dma_semaphore, #tpu.memory_space<semaphore_mem>> -> memref<!tpu.dma_semaphore, #tpu.memory_space<semaphore_mem>>
      tpu.enqueue_dma source(%27 : memref<1x64xf32, #tpu.memory_space<any>>) target(%28 : memref<1x64xf32, #tpu.memory_space<vmem>>) target_semaphore(%30 : memref<!tpu.dma_semaphore, #tpu.memory_space<semaphore_mem>>)
    }
    %c128_i32_1 = arith.constant 128 : i32
    %c0_i32_2 = arith.constant 0 : i32
    %c128_i32_3 = arith.constant 128 : i32
    %2 = arith.addi %c0_i32_2, %c128_i32_3 : i32
    %c1_i32_4 = arith.constant 1 : i32
    scf.for %arg8 = %c0_i32_2 to %2 step %c1_i32_4  : i32 {
      %c0_i32_13 = arith.constant 0 : i32
      %c0_i32_14 = arith.constant 0 : i32
      %c0_i32_15 = arith.constant 0 : i32
      %17 = tpu.memref_slice %arg3[%c0_i32_14, %c0_i32_15] : memref<32x64xf32, #tpu.memory_space<any>> -> memref<1x64xf32, #tpu.memory_space<any>>
      %c0_i32_16 = arith.constant 0 : i32
      %18 = tpu.memref_slice %arg5[%arg8, %c0_i32_16] : memref<128x64xf32, #tpu.memory_space<vmem>> -> memref<1x64xf32, #tpu.memory_space<vmem>>
      %19 = tpu.memref_slice %arg7[%c0_i32_13] : memref<2x!tpu.dma_semaphore, #tpu.memory_space<semaphore_mem>> -> memref<1x!tpu.dma_semaphore, #tpu.memory_space<semaphore_mem>>
      %20 = tpu.memref_squeeze %19 : memref<1x!tpu.dma_semaphore, #tpu.memory_space<semaphore_mem>> -> memref<!tpu.dma_semaphore, #tpu.memory_space<semaphore_mem>>
      tpu.wait_dma2 semaphore(%20 : memref<!tpu.dma_semaphore, #tpu.memory_space<semaphore_mem>>) src(%17 : memref<1x64xf32, #tpu.memory_space<any>>) dst(%18 : memref<1x64xf32, #tpu.memory_space<vmem>>)
      %c1_i32_17 = arith.constant 1 : i32
      %c0_i32_18 = arith.constant 0 : i32
      %c0_i32_19 = arith.constant 0 : i32
      %21 = tpu.memref_slice %arg3[%c0_i32_18, %c0_i32_19] : memref<32x64xf32, #tpu.memory_space<any>> -> memref<1x64xf32, #tpu.memory_space<any>>
      %c0_i32_20 = arith.constant 0 : i32
      %22 = tpu.memref_slice %arg6[%arg8, %c0_i32_20] : memref<128x64xf32, #tpu.memory_space<vmem>> -> memref<1x64xf32, #tpu.memory_space<vmem>>
      %23 = tpu.memref_slice %arg7[%c1_i32_17] : memref<2x!tpu.dma_semaphore, #tpu.memory_space<semaphore_mem>> -> memref<1x!tpu.dma_semaphore, #tpu.memory_space<semaphore_mem>>
      %24 = tpu.memref_squeeze %23 : memref<1x!tpu.dma_semaphore, #tpu.memory_space<semaphore_mem>> -> memref<!tpu.dma_semaphore, #tpu.memory_space<semaphore_mem>>
      tpu.wait_dma2 semaphore(%24 : memref<!tpu.dma_semaphore, #tpu.memory_space<semaphore_mem>>) src(%21 : memref<1x64xf32, #tpu.memory_space<any>>) dst(%22 : memref<1x64xf32, #tpu.memory_space<vmem>>)
    }
    %c128_i32_5 = arith.constant 128 : i32
    %c0 = arith.constant 0 : index
    %c0_6 = arith.constant 0 : index
    %3 = vector.load %arg5[%c0, %c0_6] : memref<128x64xf32, #tpu.memory_space<vmem>>, vector<128x64xf32>
    %c0_7 = arith.constant 0 : index
    %c0_8 = arith.constant 0 : index
    %4 = vector.load %arg6[%c0_7, %c0_8] : memref<128x64xf32, #tpu.memory_space<vmem>>, vector<128x64xf32>
    %5 = arith.mulf %3, %4 : vector<128x64xf32>
    %cst = arith.constant dense<0.000000e+00> : vector<128xf32>
    %6 = vector.multi_reduction <add>, %5, %cst [1] : vector<128x64xf32> to vector<128xf32>
    %cst_9 = arith.constant 0.000000e+00 : f32
    %7 = vector.broadcast %cst_9 : f32 to vector<128xf32>
    %8 = arith.minimumf %6, %7 : vector<128xf32>
    %9 = math.absf %6 : vector<128xf32>
    %cst_10 = arith.constant 0.000000e+00 : f32
    %10 = vector.broadcast %cst_10 : f32 to vector<128xf32>
    %11 = arith.subf %10, %9 : vector<128xf32>
    %12 = math.exp %11 : vector<128xf32>
    %13 = math.log1p %12 : vector<128xf32>
    %14 = arith.subf %8, %13 : vector<128xf32>
    %15 = vector.shape_cast %14 : vector<128xf32> to vector<1x128xf32>
    %c0_11 = arith.constant 0 : index
    %c0_12 = arith.constant 0 : index
    %16 = vector.load %arg4[%c0_11, %c0_12] : memref<1x128xf32, #tpu.memory_space<vmem>>, vector<1x128xf32>
    tpu.vector_store %arg4[%c0_11, %c0_12], %15 {strides = array<i32>} : memref<1x128xf32, #tpu.memory_space<vmem>>, vector<1x128xf32>,
    return
  }
  func.func @transform_1(%arg0: i32, %arg1: memref<128xi32, #tpu.memory_space<smem>>, %arg2: memref<128xi32, #tpu.memory_space<smem>>) -> (i32, i32) {
    %c0_i32 = arith.constant 0 : i32
    %c0_i32_0 = arith.constant 0 : i32
    return %c0_i32, %arg0 : i32, i32
  }
}

</mosaic_0001>

<bundles_post_ra>
// kernel: tpu_custom_call.1
= control target key start
LH: loop header
LB: loop body
LE: loop exit
PB: predicated region body
PF: predicated region fallthrough
CT: control target
= control target key end

     0   :  { %s741_s18 = smov [#allocation6]   ;;  %s742_s19 = smov [#allocation7]   ;;  %s1137_s0 = inlined_call_operand.hbm [shape: s32[128], index: 0, kind: input, shape index: {}]   ;;  %s1138_s2 = inlined_call_operand.hbm [shape: f32[32,64], index: 2, kind: input, shape index: {}]   ;;  %s1139_s3 = inlined_call_operand.hbm [shape: f32[1,128], index: 3, kind: output, shape index: {}]   ;;  %s1140_s1 = inlined_call_operand.hbm [shape: s32[128], index: 1, kind: input, shape index: {}]  }
   0x1   :  { %s9_s14 = sshll.u32 %s1137_s0, 4  ;;  %s14_s17 = sshll.u32 %s1140_s1, 4  ;;  %s10_s14 = int_to_ptr.hbm [resolvable:$true] %s9_s14  ;;  %s15_s17 = int_to_ptr.hbm [resolvable:$true] %s14_s17 }
   0x2   :  { %12 = dma.hbm_to_smem %s10_s14, 16, %s741_s18, [#allocation5] }
   0x3   :  { %17 = dma.hbm_to_smem %s15_s17, 16, %s742_s19, [#allocation5] }
   0x4   :  { %725 = dma.done.wait [#allocation5], 32 }
   0x5   :  { %726 = vsyncadd [#allocation5], 4294967264 }
   0x6   :  { %20 = sfence }
   0x7   :  { %21 = vsyncpa [#allocation9], 0  ;;  %s772_s20 = smov 0  }
   0x8 LB: > { %s30_s0 = sld [smem:[#allocation6 + %s735_s20]]  ;;  %s33_s21 = scalar_lea.vmem [#allocation2], %s735_s20  ;;  %s735_s20 = sphi %s772_s20, %s28_s20  }
   0x9   : > { %s31_s1 = sld [smem:[#allocation7 + %s735_s20]]  ;;  %s780_s22 = sshll.u32 %s33_s21, 4  ;;  %s44_s22 = int_to_ptr.vmem [resolvable:$true] %s780_s22 }
   0xa   : > { %s48_s23 = scalar_lea.vmem [#allocation3], %s735_s20  ;;  %s649_s10 = scalar_lea.hbm %s1138_s2, 32 }
   0xb   : > { %s783_s24 = sshll.u32 %s48_s23, 4  ;;  %s60_s24 = int_to_ptr.vmem [resolvable:$true] %s783_s24 }
   0xe   : > { %s32_s27 = scalar_lea.hbm %s1138_s2, %s30_s0 }
   0xf   : > { %s41_s28 = sshll.u32 %s32_s27, 4  ;;  %s47_s4 = scalar_lea.hbm %s1138_s2, %s31_s1  ;;  %s42_s28 = int_to_ptr.hbm [resolvable:$true] %s41_s28 }
  0x10   : > { %s793_s5 = sshll.u32 %s47_s4, 4  ;;  %s645_s6 = sshra.s32 %s42_s28, 4  ;;  %s646_s6 = int_to_ptr.hbm [resolvable:$true] %s645_s6  ;;  %s58_s5 = int_to_ptr.hbm [resolvable:$true] %s793_s5 }
  0x11   : > { %s647_s7 = scalar_lea.hbm %s646_s6, 1  ;;  %p650_p1 = scmp.lt.s32.totalorder %s646_s6, %s1138_s2 }
  0x12   : > { %p648_p0 = scmp.ne.s32.totalorder %s646_s6, %s647_s7  ;;  %p651_p2 = scmp.lt.s32.totalorder %s649_s10, %s647_s7 }
  0x14   : > { %p652_p3 = por %p651_p2, %p650_p1 }
  0x16   : > { %p653_p4 = pnand %p652_p3, %p648_p0 }
  0x18   : > { %656 = shalt.err (!%p653_p4)  }
  0x19   : > { %s657_s13 = sshra.s32 %s44_s22, 4  ;;  %s743_s15 = smov [#allocation2]   ;;  %s658_s13 = int_to_ptr.vmem [resolvable:$true] %s657_s13 }
  0x1a   : > { %s659_s14 = scalar_lea.vmem %s658_s13, 1  ;;  %s661_s16 = scalar_lea.vmem %s743_s15, 128 }
  0x1b   : > { %p660_p5 = scmp.ne.s32.totalorder %s658_s13, %s659_s14  ;;  %p662_p6 = scmp.lt.s32.totalorder %s658_s13, [#allocation2] }
  0x1c   : > { %p663_p7 = scmp.lt.s32.totalorder %s661_s16, %s659_s14 }
  0x1e   : > { %p664_p8 = por %p663_p7, %p662_p6 }
  0x20   : > { %p665_p9 = pnand %p664_p8, %p660_p5 }
  0x22   : > { %668 = shalt.err (!%p665_p9)  }
  0x23   : > { %46 = dma.hbm_to_vmem [thread:$0]  %s42_s28, 16, %s44_s22, [#allocation4] }
  0x24   : > { %s669_s17 = sshra.s32 %s58_s5, 4  ;;  %s670_s17 = int_to_ptr.hbm [resolvable:$true] %s669_s17 }
  0x25   : > { %s671_s18 = scalar_lea.hbm %s670_s17, 1  ;;  %p674_p11 = scmp.lt.s32.totalorder %s670_s17, %s1138_s2 }
  0x26   : > { %p672_p10 = scmp.ne.s32.totalorder %s670_s17, %s671_s18  ;;  %p675_p12 = scmp.lt.s32.totalorder %s649_s10, %s671_s18 }
  0x28   : > { %p676_p13 = por %p675_p12, %p674_p11 }
  0x2a   : > { %p677_p0 = pnand %p676_p13, %p672_p10 }
  0x2c   : > { %680 = shalt.err (!%p677_p0)  }
  0x2d   : > { %s681_s1 = sshra.s32 %s60_s24, 4  ;;  %s744_s22 = smov [#allocation3]   ;;  %s682_s1 = int_to_ptr.vmem [resolvable:$true] %s681_s1 }
  0x2e   : > { %s683_s21 = scalar_lea.vmem %s682_s1, 1  ;;  %s685_s23 = scalar_lea.vmem %s744_s22, 128 }
  0x2f   : > { %p684_p1 = scmp.ne.s32.totalorder %s682_s1, %s683_s21  ;;  %p686_p2 = scmp.lt.s32.totalorder %s682_s1, [#allocation3] }
  0x30   : > { %p687_p3 = scmp.lt.s32.totalorder %s685_s23, %s683_s21 }
  0x32   : > { %p688_p4 = por %p687_p3, %p686_p2 }
  0x34   : > { %p689_p5 = pnand %p688_p4, %p684_p1 }
  0x36   : > { %692 = shalt.err (!%p689_p5)  }
  0x37   : > { %62 = dma.hbm_to_vmem [thread:$0]  %s58_s5, 16, %s60_s24, [#allocation4 + $0x1] }
  0x38   : > { %s28_s20 = sadd.s32 1, %s735_s20  }
  0x39   : > { %p25_p6 = scmp.ge.s32.totalorder %s28_s20, 128  }
  0x3a   :  { %s737_s25 = smov (%p25_p6), 0  }
  0x3b   :  { %27 = sbr.rel (!%p25_p6) target bundleno = 8 (0x8), region = 49 }
  0x40 LB: > { %727 = dma.done.wait [#allocation4], 16  ;;  %s739_s25 = sphi %s737_s25, %s68_s25  }
  0x41   : > { %728 = vsyncadd [#allocation4], 4294967280 }
  0x42   : > { %729 = dma.done.wait [#allocation4 + $0x1], 16 }
  0x43   : > { %730 = vsyncadd [#allocation4 + $0x1], 4294967280  ;;  %s68_s25 = sadd.s32 1, %s739_s25  }
  0x44   : > { %p65_p7 = scmp.ge.s32.totalorder %s68_s25, 128  }
  0x45   :  { %v79_v0 = vld [vmem:[#allocation2 + $0x20] sm:$0xff] (%p65_p7)  ;;  %vm123_vm0 = vcmask (%p65_p7), 523264   ;;  %v77_v2 = vld [vmem:[#allocation2 + $0x10] sm:$0xff] (%p65_p7)  ;;  %v80_v9 = vld [vmem:[#allocation2 + $0x28] sm:$0xff] (%p65_p7)  ;;  %vm433_vm6 = vcmask (%p65_p7), 130112   ;;  %vm437_vm7 = vcmask (%p65_p7), 195712  }
  0x46   :  { %67 = sbr.rel (!%p65_p7) target bundleno = 64 (0x40), region = 60  ;;  %v95_v1 = vld [vmem:[#allocation3 + $0x20] sm:$0xff] (%p65_p7)  ;;  %v93_v4 = vld [vmem:[#allocation3 + $0x10] sm:$0xff] (%p65_p7)  ;;  %v96_v10 = vld [vmem:[#allocation3 + $0x28] sm:$0xff] (%p65_p7)  ;;  %vm441_vm9 = vcmask (%p65_p7), 261312   ;;  %vm445_vm10 = vcmask (%p65_p7), 326912  }
  0x47   :  { %v111_v3 = vmul.f32 (%p65_p7), %v95_v1, %v79_v0  ;;  %v75_v5 = vld [vmem:[#allocation2] sm:$0xff] (%p65_p7)  ;;  %v109_v7 = vmul.f32 (%p65_p7), %v93_v4, %v77_v2  ;;  %v78_v11 = vld [vmem:[#allocation2 + $0x18] sm:$0xff] (%p65_p7)  ;;  %v76_v14 = vld [vmem:[#allocation2 + $0x8] sm:$0xff] (%p65_p7)  ;;  %v112_v18 = vmul.f32 (%p65_p7), %v96_v10, %v80_v9  ;;  %vm449_vm11 = vcmask (%p65_p7), 392512   ;;  %s745_s2 = smov (%p65_p7), [#allocation8]   ;;  %s500_s27 = sshll.u32 (%p65_p7), %s1139_s3, 4  ;;  %s501_s27 = int_to_ptr.hbm [resolvable:$true] %s500_s27 }
  0x48   :  { %v91_v6 = vld [vmem:[#allocation3] sm:$0xff] (%p65_p7)  ;;  %v94_v13 = vld [vmem:[#allocation3 + $0x18] sm:$0xff] (%p65_p7)  ;;  %v92_v15 = vld [vmem:[#allocation3 + $0x8] sm:$0xff] (%p65_p7)  ;;  %vm453_vm15 = vcmask (%p65_p7), 458112   ;;  %s498_s20 = sshll.u32 (%p65_p7), %s745_s2, 4  ;;  %s499_s20 = int_to_ptr.vmem [resolvable:$true] %s498_s20 }
  0x49   :  { %v107_v8 = vmul.f32 (%p65_p7), %v91_v6, %v75_v5  ;;  %v136_v12 = vsel (%p65_p7), %vm123_vm0, %v111_v3, 0.0  ;;  %v130_v16 = vsel (%p65_p7), %vm123_vm0, %v109_v7, 0.0  ;;  %v110_v19 = vmul.f32 (%p65_p7), %v94_v13, %v78_v11  ;;  %v83_v24 = vld [vmem:[#allocation2 + $0x40] sm:$0xff] (%p65_p7)  ;;  %v82_v26 = vld [vmem:[#allocation2 + $0x38] sm:$0xff] (%p65_p7)  ;;  %v81_v28 = vld [vmem:[#allocation2 + $0x30] sm:$0xff] (%p65_p7) }
  0x4a   :  { %137 = vadd.xlane.f32.xlu2 (%p65_p7), %v136_v12  ;;  %131 = vadd.xlane.f32.xlu1 (%p65_p7), %v130_v16  ;;  %v108_v20 = vmul.f32 (%p65_p7), %v92_v15, %v76_v14  ;;  %v139_v21 = vsel (%p65_p7), %vm123_vm0, %v112_v18, 0.0  ;;  %v99_v25 = vld [vmem:[#allocation3 + $0x40] sm:$0xff] (%p65_p7)  ;;  %v98_v27 = vld [vmem:[#allocation3 + $0x38] sm:$0xff] (%p65_p7)  ;;  %v97_v29 = vld [vmem:[#allocation3 + $0x30] sm:$0xff] (%p65_p7) }
  0x4b   :  { %v124_v17 = vsel %vm123_vm0, %v107_v8, 0.0  ;;  %v133_v22 = vsel %vm123_vm0, %v110_v19, 0.0  ;;  %v115_v30 = vmul.f32 %v99_v25, %v83_v24  ;;  %v114_v31 = vmul.f32 %v98_v27, %v82_v26  ;;  %v86_v36 = vld [vmem:[#allocation2 + $0x58] sm:$0xff]  ;;  %v85_v38 = vld [vmem:[#allocation2 + $0x50] sm:$0xff]  ;;  %v84_v40 = vld [vmem:[#allocation2 + $0x48] sm:$0xff] }
  0x4c   :  { %125 = vadd.xlane.f32.xlu0 %v124_v17  ;;  %v127_v23 = vsel %vm123_vm0, %v108_v20, 0.0  ;;  %v113_v32 = vmul.f32 %v97_v29, %v81_v28  ;;  %v102_v37 = vld [vmem:[#allocation3 + $0x58] sm:$0xff]  ;;  %v101_v39 = vld [vmem:[#allocation3 + $0x50] sm:$0xff]  ;;  %v100_v41 = vld [vmem:[#allocation3 + $0x48] sm:$0xff] }
  0x4d   :  { %v148_v33 = vsel %vm123_vm0, %v115_v30, 0.0  ;;  %v145_v34 = vsel %vm123_vm0, %v114_v31, 0.0  ;;  %v118_v42 = vmul.f32 %v102_v37, %v86_v36  ;;  %v117_v43 = vmul.f32 %v101_v39, %v85_v38  ;;  %v89_v48 = vld [vmem:[#allocation2 + $0x70] sm:$0xff]  ;;  %v88_v50 = vld [vmem:[#allocation2 + $0x68] sm:$0xff]  ;;  %v87_v52 = vld [vmem:[#allocation2 + $0x60] sm:$0xff] }
  0x4e   :  { %v142_v35 = vsel %vm123_vm0, %v113_v32, 0.0  ;;  %v116_v44 = vmul.f32 %v100_v41, %v84_v40  ;;  %v105_v49 = vld [vmem:[#allocation3 + $0x70] sm:$0xff]  ;;  %v104_v51 = vld [vmem:[#allocation3 + $0x68] sm:$0xff]  ;;  %v103_v53 = vld [vmem:[#allocation3 + $0x60] sm:$0xff] }
  0x4f   :  { %v157_v45 = vsel %vm123_vm0, %v118_v42, 0.0  ;;  %v154_v46 = vsel %vm123_vm0, %v117_v43, 0.0  ;;  %v121_v54 = vmul.f32 %v105_v49, %v89_v48  ;;  %v120_v55 = vmul.f32 %v104_v51, %v88_v50  ;;  %v90_v60 = vld [vmem:[#allocation2 + $0x78] sm:$0xff] }
  0x50   :  { %v151_v47 = vsel %vm123_vm0, %v116_v44, 0.0  ;;  %v119_v56 = vmul.f32 %v103_v53, %v87_v52  ;;  %v106_v61 = vld [vmem:[#allocation3 + $0x78] sm:$0xff] }
  0x51   :  { %v166_v57 = vsel %vm123_vm0, %v121_v54, 0.0  ;;  %v163_v58 = vsel %vm123_vm0, %v120_v55, 0.0  ;;  %v122_v62 = vmul.f32 %v106_v61, %v90_v60 }
  0x52   :  { %140 = vadd.xlane.f32.xlu2 %v139_v21  ;;  %134 = vadd.xlane.f32.xlu1 %v133_v22  ;;  %v160_v59 = vsel %vm123_vm0, %v119_v56, 0.0  ;;  %v428_v22 = vlaneseq }
  0x53   :  { %v169_v63 = vsel %vm123_vm0, %v122_v62, 0.0  ;;  %vm457_vm0 = vcmask 523712  }
  0x54   :  { %128 = vadd.xlane.f32.xlu0 %v127_v23  ;;  %v848_v27 = vand.u32 127, %v428_v22 }
  0x56   :  { %v864_v37 = vadd.s32 4294967280, %v848_v27  ;;  %v883_v48 = vadd.s32 4294967288, %v848_v27  ;;  %v912_v22 = vadd.s32 4294967232, %v848_v27 }
  0x5a   :  { %149 = vadd.xlane.f32.xlu2 %v148_v33  ;;  %146 = vadd.xlane.f32.xlu1 %v145_v34 }
  0x5c   :  { %143 = vadd.xlane.f32.xlu0 %v142_v35  ;;  %v861_v35 = vadd.s32 4294967264, %v848_v27 }
  0x62   :  { %158 = vadd.xlane.f32.xlu2 %v157_v45  ;;  %155 = vadd.xlane.f32.xlu1 %v154_v46  ;;  %v875_v45 = vadd.s32 4294967256, %v848_v27 }
  0x64   :  { %152 = vadd.xlane.f32.xlu0 %v151_v47  ;;  %v880_v47 = vadd.s32 4294967272, %v848_v27 }
  0x6a   :  { %167 = vadd.xlane.f32.xlu2 %v166_v57  ;;  %164 = vadd.xlane.f32.xlu1 %v163_v58 }
  0x6c   :  { %161 = vadd.xlane.f32.xlu0 %v160_v59 }
  0x74   :  { %170 = vadd.xlane.f32.xlu0 %v169_v63 }
  0xbd   :  { %v828_v0 = vpop.xlane.xlu2 %137  ;;  %v830_v1 = vpop.xlane.xlu1 %131 }
  0xbe   :  { %v192_v3 = vand.u32 2147483647, %v828_v0  ;;  %v190_v4 = vand.u32 2147483647, %v830_v1  ;;  %v176_v42 = vmin.f32 %v828_v0, 0.0  ;;  %v174_v43 = vmin.f32 %v830_v1, 0.0 }
  0xbf   :  { %v832_v2 = vpop.xlane.xlu0 %125  ;;  %v978_v1 = vadd.s32 4294967240, %v848_v27 }
  0xc0   :  { %v208_v5 = vsub.f32 0.0, %v192_v3  ;;  %v188_v6 = vand.u32 2147483647, %v832_v2  ;;  %v206_v8 = vsub.f32 0.0, %v190_v4  ;;  %v172_v44 = vmin.f32 %v832_v2, 0.0 }
  0xc2   :  { %v228_v12 = vmul.f32 1.442695, %v208_v5  ;;  %v204_v13 = vsub.f32 0.0, %v188_v6  ;;  %v224_v16 = vmul.f32 1.442695, %v206_v8 }
  0xc4   :  { %557 = vpow2.f32 %v228_v12  ;;  %v220_v18 = vmul.f32 1.442695, %v204_v13 }
  0xc5   :  { %v837_v7 = vpop.xlane.xlu2 %140  ;;  %v839_v9 = vpop.xlane.xlu1 %134  ;;  %559 = vpow2.f32 %v224_v16 }
  0xc6   :  { %v193_v14 = vand.u32 2147483647, %v837_v7  ;;  %v191_v15 = vand.u32 2147483647, %v839_v9  ;;  %561 = vpow2.f32 %v220_v18  ;;  %v177_v58 = vmin.f32 %v837_v7, 0.0 }
  0xc7   :  { %v841_v10 = vpop.xlane.xlu0 %128  ;;  %v175_v63 = vmin.f32 %v839_v9, 0.0 }
  0xc8   :  { %v189_v11 = vand.u32 2147483647, %v841_v10  ;;  %v209_v19 = vsub.f32 0.0, %v193_v14  ;;  %v207_v20 = vsub.f32 0.0, %v191_v15  ;;  %v173_v3 = vmin.f32 %v841_v10, 0.0 }
  0xca   :  { %v205_v17 = vsub.f32 0.0, %v189_v11  ;;  %v230_v23 = vmul.f32 1.442695, %v209_v19  ;;  %v226_v24 = vmul.f32 1.442695, %v207_v20  ;;  %v558_v25 = vpop.eup %557 }
  0xcb   :  { %v846_v26 = vpop.eup %559  ;;  %v288_v29 = vadd.f32 1.0, %v558_v25  ;;  %v291_v36 = vmul.f32 -0.5, %v558_v25  ;;  %v294_v52 = vand.u32 2147483647, %v558_v25 }
  0xcc   :  { %v222_v21 = vmul.f32 1.442695, %v205_v17  ;;  %v852_v30 = vpop.eup %561  ;;  %v270_v33 = vadd.f32 1.0, %v846_v26  ;;  %v273_v53 = vmul.f32 -0.5, %v846_v26  ;;  %v276_v54 = vand.u32 2147483647, %v846_v26 }
  0xcd   :  { %v850_v28 = vpop.xlane.xlu2 %149  ;;  %v854_v31 = vpop.xlane.xlu1 %146  ;;  %v252_v38 = vadd.f32 1.0, %v852_v30  ;;  %v292_v51 = vadd.f32 1.0, %v291_v36  ;;  %v255_v57 = vmul.f32 -0.5, %v852_v30  ;;  %vm899_vm1 = vcmp.lt.f32.partialorder %v294_v52, 0.0004427343 }
  0xce   :  { %563 = vpow2.f32 %v222_v21  ;;  %v196_v34 = vand.u32 2147483647, %v850_v28  ;;  %v195_v40 = vand.u32 2147483647, %v854_v31  ;;  %v274_v11 = vadd.f32 1.0, %v273_v53 }
  0xcf   :  { %565 = vpow2.f32 %v230_v23  ;;  %v885_v50 = vpop.xlane.xlu0 %143  ;;  %v293_v6 = vmul.f32 %v558_v25, %v292_v51  ;;  %vm903_vm2 = vcmp.lt.f32.partialorder %v276_v54, 0.0004427343  ;;  %v258_v15 = vand.u32 2147483647, %v852_v30 }
  0xd0   :  { %567 = vpow2.f32 %v226_v24  ;;  %v212_v49 = vsub.f32 0.0, %v196_v34  ;;  %v211_v56 = vsub.f32 0.0, %v195_v40  ;;  %v194_v60 = vand.u32 2147483647, %v885_v50 }
  0xd1   :  { %569 = vlog2.f32 %v288_v29  ;;  %v256_v21 = vadd.f32 1.0, %v255_v57  ;;  %vm919_vm3 = vcmp.lt.f32.partialorder %v258_v15, 0.0004427343 }
  0xd2   :  { %571 = vlog2.f32 %v270_v33  ;;  %v236_v5 = vmul.f32 1.442695, %v212_v49  ;;  %v210_v12 = vsub.f32 0.0, %v194_v60  ;;  %v234_v16 = vmul.f32 1.442695, %v211_v56 }
  0xd3   :  { %v275_v33 = vmul.f32 %v846_v26, %v274_v11 }
  0xd4   :  { %v856_v32 = vpop.eup %563  ;;  %v232_v29 = vmul.f32 1.442695, %v210_v12 }
  0xd5   :  { %v261_v39 = vadd.f32 1.0, %v856_v32  ;;  %v869_v41 = vpop.eup %565  ;;  %v894_v61 = vpop.xlane.xlu2 %158  ;;  %v264_v4 = vmul.f32 -0.5, %v856_v32  ;;  %v267_v36 = vand.u32 2147483647, %v856_v32 }
  0xd6   :  { %v877_v46 = vpop.eup %567  ;;  %v297_v55 = vadd.f32 1.0, %v869_v41  ;;  %v199_v17 = vand.u32 2147483647, %v894_v61  ;;  %v909_v18 = vpop.xlane.xlu1 %155  ;;  %v300_v24 = vmul.f32 -0.5, %v869_v41  ;;  %v303_v34 = vand.u32 2147483647, %v869_v41 }
  0xd7   :  { %573 = vlog2.f32 %v261_v39  ;;  %v279_v59 = vadd.f32 1.0, %v877_v46  ;;  %v570_v62 = vpop.eup %569  ;;  %v265_v25 = vadd.f32 1.0, %v264_v4  ;;  %v282_v26 = vmul.f32 -0.5, %v877_v46  ;;  %v926_v54 = vpop.xlane.xlu0 %152 }
  0xd8   :  { %575 = vlog2.f32 %v252_v38  ;;  %v572_v13 = vpop.eup %571  ;;  %v290_v20 = vmul.f32 0.6931472, %v570_v62  ;;  %v198_v38 = vand.u32 2147483647, %v909_v18  ;;  %v215_v49 = vsub.f32 0.0, %v199_v17 }
  0xd9   :  { %577 = vlog2.f32 %v297_v55  ;;  %v272_v52 = vmul.f32 0.6931472, %v572_v13  ;;  %v301_v56 = vadd.f32 1.0, %v300_v24  ;;  %v266_v57 = vmul.f32 %v856_v32, %v265_v25 }
  0xda   :  { %579 = vlog2.f32 %v279_v59  ;;  %v296_v51 = vsel %vm899_vm1, %v293_v6, %v290_v20  ;;  %v180_v59 = vmin.f32 %v850_v28, 0.0  ;;  %v257_v62 = vmul.f32 %v852_v30, %v256_v21 }
  0xdb   :  { %581 = vpow2.f32 %v236_v5  ;;  %vm931_vm4 = vcmp.lt.f32.partialorder %v303_v34, 0.0004427343  ;;  %vm935_vm5 = vcmp.lt.f32.partialorder %v267_v36, 0.0004427343  ;;  %v214_v6 = vsub.f32 0.0, %v198_v38 }
  0xdc   :  { %583 = vpow2.f32 %v234_v16  ;;  %v943_v32 = vsub.f32 %v176_v42, %v296_v51  ;;  %v242_v30 = vmul.f32 1.442695, %v215_v49  ;;  %v197_v12 = vand.u32 2147483647, %v926_v54 }
  0xdd   :  { %v574_v19 = vpop.eup %573  ;;  %585 = vpow2.f32 %v232_v29  ;;  %v948_v13 = vpop.xlane.xlu2 %167  ;;  %v278_v15 = vsel %vm903_vm2, %v275_v33, %v272_v52  ;;  %v283_v17 = vadd.f32 1.0, %v282_v26  ;;  %v302_v20 = vmul.f32 %v869_v41, %v301_v56 }
  0xde   :  { %v576_v23 = vpop.eup %575  ;;  %v263_v40 = vmul.f32 0.6931472, %v574_v19  ;;  %v240_v19 = vmul.f32 1.442695, %v214_v6  ;;  %v285_v21 = vand.u32 2147483647, %v877_v46  ;;  %v398_v34 = vsub.f32 %v174_v43, %v278_v15  ;;  %v980_v2 = vpop.xlane.xlu1 %164 }
  0xdf   :  { %v254_v53 = vmul.f32 0.6931472, %v576_v23  ;;  %v578_v55 = vpop.eup %577  ;;  %v213_v23 = vsub.f32 0.0, %v197_v12  ;;  %v202_v29 = vand.u32 2147483647, %v948_v13  ;;  %587 = vpow2.f32 %v242_v30 }
  0xe0   :  { %v580_v60 = vpop.eup %579  ;;  %v269_v11 = vsel %vm935_vm5, %v266_v57, %v263_v40  ;;  %v299_v42 = vmul.f32 0.6931472, %v578_v55  ;;  %v284_v38 = vmul.f32 %v877_v46, %v283_v17  ;;  %589 = vpow2.f32 %v240_v19 }
  0xe1   :  { %v939_v8 = vpop.eup %581  ;;  %v260_v16 = vsel %vm919_vm3, %v257_v62, %v254_v53  ;;  %v281_v24 = vmul.f32 0.6931472, %v580_v60  ;;  %v397_v25 = vsub.f32 %v173_v3, %v269_v11  ;;  %v238_v36 = vmul.f32 1.442695, %v213_v23  ;;  %v989_v53 = vpop.xlane.xlu0 %161 }
  0xe2   :  { %v954_v0 = vpop.eup %583  ;;  %v324_v14 = vadd.f32 1.0, %v939_v8  ;;  %v396_v41 = vsub.f32 %v172_v44, %v260_v16  ;;  %v305_v3 = vsel %vm931_vm4, %v302_v20, %v299_v42  ;;  %vm973_vm8 = vcmp.lt.f32.partialorder %v285_v21, 0.0004427343 }
  0xe3   :  { %v962_v33 = vpop.eup %585  ;;  %v315_v39 = vadd.f32 1.0, %v954_v0  ;;  %591 = vpow2.f32 %v238_v36  ;;  %v287_v43 = vsel %vm973_vm8, %v284_v38, %v281_v24  ;;  %v432_v44 = vperm.slane %v397_v25, %v883_v48 }
  0xe4   :  { %v306_v10 = vadd.f32 1.0, %v962_v33  ;;  %593 = vlog2.f32 %v324_v14  ;;  %v218_v46 = vsub.f32 0.0, %v202_v29  ;;  %v444_v49 = vperm.slane %v943_v32, %v861_v35 }
  0xe5   :  { %v436_v51 = vperm.slane %v398_v34, %v864_v37  ;;  %v179_v52 = vmin.f32 %v854_v31, 0.0  ;;  %v430_v26 = vperm.slane %v396_v41, %v848_v27  ;;  %v993_v55 = vadd.s32 4294967248, %v848_v27  ;;  %v996_v56 = vpop.eup %587 }
  0xe6   :  { %595 = vlog2.f32 %v306_v10  ;;  %v201_v48 = vand.u32 2147483647, %v980_v2  ;;  %v1000_v57 = vsub.f32 %v177_v58, %v305_v3  ;;  %v399_v37 = vsub.f32 %v175_v63, %v287_v43  ;;  %v1006_v4 = vpop.eup %589 }
  0xe7   :  { %597 = vlog2.f32 %v315_v39  ;;  %v327_v60 = vmul.f32 -0.5, %v939_v8  ;;  %v178_v62 = vmin.f32 %v885_v50, 0.0  ;;  %v434_v5 = vsel %vm433_vm6, %v432_v44, %v430_v26 }
  0xe8   :  { %v309_v6 = vmul.f32 -0.5, %v962_v33  ;;  %v1011_v11 = vadd.s32 4294967208, %v848_v27  ;;  %v248_v7 = vmul.f32 1.442695, %v218_v46  ;;  %v318_v9 = vmul.f32 -0.5, %v954_v0 }
  0xe9   :  { %v1013_v58 = vpop.eup %591  ;;  %v183_v63 = vmin.f32 %v894_v61, 0.0  ;;  %v217_v30 = vsub.f32 0.0, %v201_v48  ;;  %v200_v12 = vand.u32 2147483647, %v989_v53  ;;  %v330_v16 = vand.u32 2147483647, %v939_v8 }
  0xea   :  { %v594_v15 = vpop.eup %593  ;;  %v321_v17 = vand.u32 2147483647, %v954_v0  ;;  %v1021_v19 = vadd.s32 4294967216, %v848_v27  ;;  %v333_v42 = vadd.f32 1.0, %v1013_v58  ;;  %v440_v21 = vperm.slane %v399_v37, %v880_v47 }
  0xeb   :  { %v438_v23 = vsel %vm437_vm7, %v436_v51, %v434_v5  ;;  %v328_v24 = vadd.f32 1.0, %v327_v60  ;;  %v351_v25 = vadd.f32 1.0, %v996_v56  ;;  %v310_v29 = vadd.f32 1.0, %v309_v6  ;;  %v1035_v51 = vpop.xlane.xlu0 %170 }
  0xec   :  { %v596_v20 = vpop.eup %595  ;;  %v342_v34 = vadd.f32 1.0, %v1006_v4  ;;  %599 = vpow2.f32 %v248_v7  ;;  %v216_v41 = vsub.f32 0.0, %v200_v12  ;;  %v319_v36 = vadd.f32 1.0, %v318_v9 }
  0xed   :  { %v598_v14 = vpop.eup %597  ;;  %v312_v38 = vand.u32 2147483647, %v962_v33  ;;  %601 = vlog2.f32 %v333_v42  ;;  %v246_v39 = vmul.f32 1.442695, %v217_v30  ;;  %v442_v10 = vsel %vm441_vm9, %v440_v21, %v438_v23 }
  0xee   :  { %vm1030_vm12 = vcmp.lt.f32.partialorder %v330_v16, 0.0004427343  ;;  %v308_v3 = vmul.f32 0.6931472, %v596_v20  ;;  %v182_v40 = vmin.f32 %v909_v18, 0.0  ;;  %603 = vlog2.f32 %v351_v25 }
  0xef   :  { %v326_v43 = vmul.f32 0.6931472, %v594_v15  ;;  %v317_v44 = vmul.f32 0.6931472, %v598_v14  ;;  %v244_v46 = vmul.f32 1.442695, %v216_v41  ;;  %v311_v48 = vmul.f32 %v962_v33, %v310_v29 }
  0xf0   :  { %vm1037_vm13 = vcmp.lt.f32.partialorder %v321_v17, 0.0004427343  ;;  %605 = vlog2.f32 %v342_v34  ;;  %v336_v37 = vmul.f32 -0.5, %v1013_v58  ;;  %v329_v60 = vmul.f32 %v939_v8, %v328_v24 }
  0xf1   :  { %v320_v5 = vmul.f32 %v954_v0, %v319_v36  ;;  %vm1045_vm14 = vcmp.lt.f32.partialorder %v312_v38, 0.0004427343  ;;  %607 = vpow2.f32 %v246_v39  ;;  %v446_v9 = vsel %vm445_vm10, %v444_v49, %v442_v10 }
  0xf2   :  { %v1049_v7 = vpop.eup %599  ;;  %v314_v33 = vsel %vm1045_vm14, %v311_v48, %v308_v3  ;;  %609 = vpow2.f32 %v244_v46  ;;  %v203_v8 = vand.u32 2147483647, %v1035_v51  ;;  %v332_v30 = vsel %vm1030_vm12, %v329_v60, %v326_v43 }
  0xf3   :  { %v602_v0 = vpop.eup %601  ;;  %v323_v12 = vsel %vm1037_vm13, %v320_v5, %v317_v44  ;;  %v354_v15 = vmul.f32 -0.5, %v996_v56  ;;  %v345_v35 = vmul.f32 -0.5, %v1006_v4  ;;  %v448_v32 = vperm.slane %v1000_v57, %v875_v45 }
  0xf4   :  { %v337_v49 = vadd.f32 1.0, %v336_v37  ;;  %v339_v16 = vand.u32 2147483647, %v1013_v58  ;;  %v219_v17 = vsub.f32 0.0, %v203_v8  ;;  %v604_v42 = vpop.eup %603  ;;  %v402_v20 = vsub.f32 %v178_v62, %v314_v33 }
  0xf5   :  { %v1070_v21 = vadd.s32 4294967224, %v848_v27  ;;  %v181_v23 = vmin.f32 %v926_v54, 0.0  ;;  %v378_v24 = vadd.f32 1.0, %v1049_v7  ;;  %v404_v45 = vsub.f32 %v180_v59, %v332_v30 }
  0xf6   :  { %v606_v25 = vpop.eup %605  ;;  %v403_v57 = vsub.f32 %v179_v52, %v323_v12  ;;  %v450_v14 = vsel %vm449_vm11, %v448_v32, %v446_v9  ;;  %v335_v29 = vmul.f32 0.6931472, %v602_v0  ;;  %v355_v50 = vadd.f32 1.0, %v354_v15 }
  0xf7   :  { %v608_v34 = vpop.eup %607  ;;  %v357_v62 = vand.u32 2147483647, %v996_v56  ;;  %v346_v41 = vadd.f32 1.0, %v345_v35  ;;  %v348_v36 = vand.u32 2147483647, %v1006_v4  ;;  %vm461_vm1 = vcmask 589312  }
  0xf8   :  { %v610_v54 = vpop.eup %609  ;;  %v338_v38 = vmul.f32 %v1013_v58, %v337_v49  ;;  %vm1082_vm2 = vcmp.lt.f32.partialorder %v339_v16, 0.0004427343  ;;  %v369_v31 = vadd.f32 1.0, %v608_v34  ;;  %v250_v59 = vmul.f32 1.442695, %v219_v17 }
  0xf9   :  { %v452_v52 = vperm.slane %v402_v20, %v993_v55  ;;  %v344_v39 = vmul.f32 0.6931472, %v606_v25  ;;  %611 = vlog2.f32 %v378_v24  ;;  %v360_v10 = vadd.f32 1.0, %v610_v54 }
  0xfa   :  { %vm465_vm3 = vcmask 654912   ;;  %v341_v47 = vsel %vm1082_vm2, %v338_v38, %v335_v29  ;;  %613 = vlog2.f32 %v369_v31  ;;  %v372_v3 = vmul.f32 -0.5, %v608_v34 }
  0xfb   :  { %v363_v43 = vmul.f32 -0.5, %v610_v54  ;;  %v456_v58 = vperm.slane %v403_v57, %v978_v1  ;;  %v353_v44 = vmul.f32 0.6931472, %v604_v42  ;;  %v347_v46 = vmul.f32 %v1006_v4, %v346_v41 }
  0xfc   :  { %615 = vlog2.f32 %v360_v10  ;;  %v356_v26 = vmul.f32 %v996_v56, %v355_v50  ;;  %vm1092_vm4 = vcmp.lt.f32.partialorder %v357_v62, 0.0004427343  ;;  %vm1096_vm5 = vcmp.lt.f32.partialorder %v348_v36, 0.0004427343 }
  0xfd   :  { %617 = vpow2.f32 %v250_v59  ;;  %v454_v37 = vsel %vm453_vm15, %v452_v52, %v450_v14  ;;  %v350_v1 = vsel %vm1096_vm5, %v347_v46, %v344_v39  ;;  %v405_v60 = vsub.f32 %v181_v23, %v341_v47 }
  0xfe   :  { %v381_v4 = vmul.f32 -0.5, %v1049_v7  ;;  %vm469_vm6 = vcmask 720512   ;;  %v185_v56 = vmin.f32 %v980_v2, 0.0  ;;  %v373_v5 = vadd.f32 1.0, %v372_v3 }
  0xff   :  { %v364_v6 = vadd.f32 1.0, %v363_v43  ;;  %v612_v9 = vpop.eup %611  ;;  %v460_v33 = vperm.slane %v404_v45, %v912_v22  ;;  %v359_v8 = vsel %vm1092_vm4, %v356_v26, %v353_v44  ;;  %v375_v0 = vand.u32 2147483647, %v608_v34 }
 0x100   :  { %v366_v30 = vand.u32 2147483647, %v610_v54  ;;  %v614_v12 = vpop.eup %613  ;;  %v458_v15 = vsel %vm457_vm0, %v456_v58, %v454_v37  ;;  %v406_v35 = vsub.f32 %v182_v40, %v350_v1  ;;  %v475_v32 = vadd.s32 4294967200, %v848_v27 }
 0x101   :  { %v184_v2 = vmin.f32 %v989_v53, 0.0  ;;  %v464_v16 = vperm.slane %v405_v60, %v1070_v21  ;;  %v382_v17 = vadd.f32 1.0, %v381_v4  ;;  %v384_v22 = vand.u32 2147483647, %v1049_v7 }
 0x102   :  { %v616_v49 = vpop.eup %615  ;;  %v371_v42 = vmul.f32 0.6931472, %v614_v12  ;;  %v407_v23 = vsub.f32 %v183_v63, %v359_v8  ;;  %v374_v24 = vmul.f32 %v608_v34, %v373_v5  ;;  %v365_v45 = vmul.f32 %v610_v54, %v364_v6 }
 0x103   :  { %v618_v20 = vpop.eup %617  ;;  %v362_v25 = vmul.f32 0.6931472, %v616_v49  ;;  %v462_v18 = vsel %vm461_vm1, %v460_v33, %v458_v15  ;;  %vm376_vm7 = vcmp.lt.f32.partialorder %v375_v0, 0.0004427343  ;;  %vm367_vm8 = vcmp.lt.f32.partialorder %v366_v30, 0.0004427343 }
 0x104   :  { %v387_v40 = vadd.f32 1.0, %v618_v20  ;;  %v468_v53 = vperm.slane %v406_v35, %v1021_v19  ;;  %v377_v57 = vsel %vm376_vm7, %v374_v24, %v371_v42  ;;  %v390_v14 = vmul.f32 -0.5, %v618_v20 }
 0x105   :  { %v368_v21 = vsel %vm367_vm8, %v365_v45, %v362_v25  ;;  %v466_v29 = vsel %vm465_vm3, %v464_v16, %v462_v18  ;;  %v380_v50 = vmul.f32 0.6931472, %v612_v9  ;;  %vm1120_vm9 = vcmp.lt.f32.partialorder %v384_v22, 0.0004427343 }
 0x106   :  { %v408_v62 = vsub.f32 %v184_v2, %v368_v21  ;;  %619 = vlog2.f32 %v387_v40  ;;  %v383_v63 = vmul.f32 %v1049_v7, %v382_v17  ;;  %v479_v34 = vadd.s32 4294967192, %v848_v27 }
 0x107   :  { %v409_v41 = vsub.f32 %v185_v56, %v377_v57  ;;  %v470_v36 = vsel %vm469_vm6, %v468_v53, %v466_v29  ;;  %v391_v54 = vadd.f32 1.0, %v390_v14  ;;  %vm473_vm10 = vcmask 786112  }
 0x108   :  { %v476_v19 = vperm.slane %v408_v62, %v475_v32  ;;  %v472_v38 = vperm.slane %v407_v23, %v1011_v11  ;;  %v386_v28 = vsel %vm1120_vm9, %v383_v63, %v380_v50  ;;  %v393_v31 = vand.u32 2147483647, %v618_v20 }
 0x109   :  { %vm477_vm11 = vcmask 851712   ;;  %v186_v59 = vmin.f32 %v948_v13, 0.0  ;;  %v483_v7 = vadd.s32 4294967184, %v848_v27  ;;  %v480_v39 = vperm.slane %v409_v41, %v479_v34 }
 0x10a   :  { %v474_v10 = vsel %vm473_vm10, %v472_v38, %v470_v36  ;;  %vm481_vm12 = vcmask 917312   ;;  %v392_v43 = vmul.f32 %v618_v20, %v391_v54  ;;  %v487_v44 = vadd.s32 4294967176, %v848_v27 }
 0x10b   :  { %v410_v47 = vsub.f32 %v186_v59, %v386_v28  ;;  %v478_v58 = vsel %vm477_vm11, %v476_v19, %v474_v10  ;;  %v187_v11 = vmin.f32 %v1035_v51, 0.0  ;;  %vm394_vm13 = vcmp.lt.f32.partialorder %v393_v31, 0.0004427343 }
 0x10c   :  { %v620_v52 = vpop.eup %619  ;;  %v482_v55 = vsel %vm481_vm12, %v480_v39, %v478_v58  ;;  %vm485_vm14 = vcmask 982912   ;;  %vm489_vm15 = vcmask 1048512  }
 0x10d   :  { %v389_v3 = vmul.f32 0.6931472, %v620_v52  ;;  %v484_v13 = vperm.slane %v410_v47, %v483_v7 }
 0x10f   :  { %v395_v46 = vsel %vm394_vm13, %v392_v43, %v389_v3  ;;  %v486_v37 = vsel %vm485_vm14, %v484_v13, %v482_v55 }
 0x110   :  { %v411_v26 = vsub.f32 %v187_v11, %v395_v46 }
 0x112   :  { %v488_v48 = vperm.slane %v411_v26, %v487_v44 }
 0x114   :  { %v490_v27 = vsel %vm489_vm15, %v488_v48, %v486_v37 }
 0x115   :  { %492 = vst [vmem:[#allocation8] sm:$0x1] %v490_v27 }
 0x116   :  { %503 = dma.vmem_to_hbm [thread:$0]  %s499_s20, 16, %s501_s27, [#allocation9]  }
 0x117   :  { %731 = dma.done.wait [#allocation9], 16  }
 0x118   :  { %732 = vsyncadd [#allocation9], 4294967280 }
 0x119   :  { %508 = vsyncpa [#allocation9], 1 }
 0x11a   :  { %509 = vsyncmov [#allocation4] }
 0x11d   :  { %s510_s28 = vpop.sfrf %509 }
 0x11e   :  { %p536_p8 = scmp.ne.s32.totalorder %s510_s28, 0 }
 0x120   :  { %514 = shalt.err (%p536_p8)  }
 0x121   :  { %516 = vsyncmov [#allocation4 + $0x1] }
 0x124   :  { %s517_s29 = vpop.sfrf %516 }
 0x125   :  { %p537_p9 = scmp.ne.s32.totalorder %s517_s29, 0 }
 0x127   :  { %521 = shalt.err (%p537_p9)  }

</bundles_post_ra>
